<compile_context>
chip_gen: v6e
topology: v6e:2x2x1
jax: 0.10.0
libtpu: 0.0.40
codegen_flags: <defaults>
</compile_context>

<pallas_src>
import jax
import jax.numpy as jnp
import numpy as np
from jax import lax
from jax.experimental import pallas as pl
from jax.experimental.pallas import tpu as pltpu


def node_network_kernel(
    xf_ref,    # [tn, F]          node features (bf16 storage)
    xh_ref,    # [tn, H]          node hidden state (bf16 storage)
    xm_ref,    # [tn, M*E]        flattened mailbox (bf16, lane-dense 128 wide)
    wa_f_ref,  # [F,   mid+half]  f32: [W1a_top | 0]
    wa_h_ref,  # [H,   mid+half]  f32: [W1a_bot | 0]
    wa_m_ref,  # [M*E, mid+half]  f32: [0 | tile(W2a, M)]
    ba_ref,    # [1,   mid+half]  f32: [b1a | b2a]
    wb_ref,    # [mid+half, O]    f32: block-diag(W1b, W2b)
    bb_ref,    # [1, O]           f32: [b1b | b2b]
    out_ref,   # [tn, O]          f32
):
    # Upcast bf16 storage to f32 for compute (keeps native f32 VPU/EUP on v5e).
    xf = xf_ref[...].astype(jnp.float32)
    xh = xh_ref[...].astype(jnp.float32)
    xm = xm_ref[...].astype(jnp.float32)

    # Fused first layer of both branch MLPs (block-diagonal weights):
    #   h[:, :mid] = xf @ W1a_top + xh @ W1a_bot + b1a                 (net_1)
    #   h[:, mid:] = (sum_m mailbox[:, m, :]) @ W2a + b2a              (net_2)
    # The sum over messages is folded into the K=M*E MXU contraction by tiling
    # W2a over the M message slots -- no cross-lane/XLU reduction needed.
    h = (
        jnp.dot(xf, wa_f_ref[...], preferred_element_type=jnp.float32)
        + jnp.dot(xh, wa_h_ref[...], preferred_element_type=jnp.float32)
        + jnp.dot(xm, wa_m_ref[...], preferred_element_type=jnp.float32)
        + ba_ref[...]
    )
    h = jnp.maximum(h, 0.0)  # Dropout(eval) -> identity, then ReLU

    # Fused second layer (block-diagonal) emits [r1 | r2] directly in the
    # concatenated output order -> no in-kernel concat or split stores.
    r = jnp.tanh(
        jnp.dot(h, wb_ref[...], preferred_element_type=jnp.float32) + bb_ref[...]
    )

    # Row-wise L2 ("fro" over dim=1) normalization via rsqrt (EUP) + multiply.
    # No epsilon, matching torch semantics exactly (all-zero row -> NaN, same
    # as the reference module).
    inv = lax.rsqrt(jnp.sum(r * r, axis=1, keepdims=True))
    out_ref[...] = (r * inv).astype(out_ref.dtype)


def _pick_tile_n(n):
    # Prefer large node tiles (amortize the ~0.35 us per-grid-step overhead)
    # but keep at least a 2-step grid when possible so a v7x chip can shard
    # the "parallel" grid axis across both of its TensorCores.
    for t in (1024, 512, 256, 128, 64, 32, 16, 8):
        if n % t == 0 and n // t >= 2:
            return t
    return n  # single grid step; fine on single-TC v5e/v6e


def build_fused_params(params, num_node_features, num_messages):
    """Fold both branch MLPs into block-diagonal / tiled weights.

    params: w1a [F+H, mid], b1a [1, mid], w1b [mid, half], b1b [1, half],
            w2a [E, half],  b2a [1, half], w2b [half, half], b2b [1, half]
    """
    F = num_node_features
    M = num_messages
    w1a, b1a = params["w1a"], params["b1a"]
    w1b, b1b = params["w1b"], params["b1b"]
    w2a, b2a = params["w2a"], params["b2a"]
    w2b, b2b = params["w2b"], params["b2b"]
    mid = w1a.shape[1]
    half = w1b.shape[1]
    E = w2a.shape[0]
    H = w1a.shape[0] - F

    wa_f = jnp.concatenate([w1a[:F], jnp.zeros((F, half), jnp.float32)], axis=1)
    wa_h = jnp.concatenate([w1a[F:], jnp.zeros((H, half), jnp.float32)], axis=1)
    w2a_rep = jnp.tile(w2a, (M, 1))                                   # [M*E, half]
    wa_m = jnp.concatenate(
        [jnp.zeros((M * E, mid), jnp.float32), w2a_rep], axis=1)      # [M*E, mid+half]
    ba = jnp.concatenate([b1a, b2a], axis=1)                          # [1, mid+half]

    wb_top = jnp.concatenate([w1b, jnp.zeros((mid, half), jnp.float32)], axis=1)
    wb_bot = jnp.concatenate([jnp.zeros((half, half), jnp.float32), w2b], axis=1)
    wb = jnp.concatenate([wb_top, wb_bot], axis=0)                    # [mid+half, 2*half]
    bb = jnp.concatenate([b1b, b2b], axis=1)                          # [1, 2*half]
    return wa_f, wa_h, wa_m, ba, wb, bb


def node_network_forward(node_feat, node_hidden, mailbox, params, *, tile_n=None):
    """node_feat [N,F], node_hidden [N,H], mailbox [N,M,E] (any float dtype;
    bf16 storage recommended). Returns f32 [N, O]."""
    N, F = node_feat.shape
    H = node_hidden.shape[1]
    M, E = mailbox.shape[1], mailbox.shape[2]
    half = params["w1b"].shape[1]
    O = 2 * half

    if tile_n is None:
        tile_n = _pick_tile_n(N)
    assert N % tile_n == 0, (N, tile_n)

    # Flatten mailbox to a lane-dense [N, M*E] slab (contiguous -> free reshape).
    mbox_flat = mailbox.reshape(N, M * E)

    wa_f, wa_h, wa_m, ba, wb, bb = build_fused_params(params, F, M)

    def full_spec(shape):
        nd = len(shape)
        return pl.BlockSpec(shape, lambda i, nd=nd: (0,) * nd)

    return pl.pallas_call(
        node_network_kernel,
        out_shape=jax.ShapeDtypeStruct((N, O), jnp.float32),
        grid_spec=pltpu.PrefetchScalarGridSpec(
            num_scalar_prefetch=0,
            grid=(N // tile_n,),
            in_specs=[
                pl.BlockSpec((tile_n, F), lambda i: (i, 0)),
                pl.BlockSpec((tile_n, H), lambda i: (i, 0)),
                pl.BlockSpec((tile_n, M * E), lambda i: (i, 0)),
                full_spec(wa_f.shape),
                full_spec(wa_h.shape),
                full_spec(wa_m.shape),
                full_spec(ba.shape),
                full_spec(wb.shape),
                full_spec(bb.shape),
            ],
            out_specs=pl.BlockSpec((tile_n, O), lambda i: (i, 0)),
        ),
        compiler_params=pltpu.CompilerParams(
            dimension_semantics=("parallel",),
        ),
    )(node_feat, node_hidden, mbox_flat, wa_f, wa_h, wa_m, ba, wb, bb)


def reference_forward(node_feat, node_hidden, mailbox, params):
    xf = node_feat.astype(jnp.float32)
    xh = node_hidden.astype(jnp.float32)
    mb = mailbox.astype(jnp.float32)
    x1 = jnp.concatenate([xf, xh], axis=1)
    h1 = jnp.maximum(x1 @ params["w1a"] + params["b1a"], 0.0)
    r1 = jnp.tanh(h1 @ params["w1b"] + params["b1b"])
    x2 = jnp.sum(mb, axis=1)
    h2 = jnp.maximum(x2 @ params["w2a"] + params["b2a"], 0.0)
    r2 = jnp.tanh(h2 @ params["w2b"] + params["b2b"])
    res = jnp.concatenate([r1, r2], axis=1)
    return res / jnp.linalg.norm(res, axis=1, keepdims=True)


if __name__ == "__main__":
    # Module hyperparameters (first_layer=False).
    F = 16   # input_node_features_size
    H = 16   # input_node_hidden_state_size
    E = 16   # input_edge_hidden_state_size
    O = 32   # output_node_hidden_state_size (must be even)
    half = O // 2                       # out_features_both_nets
    mid = (F + H + half) // 2           # mid_features_net_1
    N = 256  # number of nodes
    M = 8    # mailbox size (messages per node) -> M*E = 128 (lane-dense)

    key = jax.random.PRNGKey(0)
    ks = jax.random.split(key, 16)

    def linear_init(kw, kb, fan_in, fan_out):
        # Deterministic uniform init mimicking nn.Linear (U(-1/sqrt(fan_in), +)).
        bound = 1.0 / np.sqrt(fan_in)
        w = jax.random.uniform(kw, (fan_in, fan_out), jnp.float32, -bound, bound)
        b = jax.random.uniform(kb, (1, fan_out), jnp.float32, -bound, bound)
        return w, b

    w1a, b1a = linear_init(ks[0], ks[1], F + H, mid)
    w1b, b1b = linear_init(ks[2], ks[3], mid, half)
    w2a, b2a = linear_init(ks[4], ks[5], E, half)
    w2b, b2b = linear_init(ks[6], ks[7], half, half)
    params = dict(w1a=w1a, b1a=b1a, w1b=w1b, b1b=b1b,
                  w2a=w2a, b2a=b2a, w2b=w2b, b2b=b2b)

    # bf16 storage for activations/mailbox (halves HBM/DMA bytes); kernel and
    # reference both upcast to f32 for compute, so results stay comparable.
    node_feat = jax.random.normal(ks[8], (N, F), jnp.float32).astype(jnp.bfloat16)
    node_hidden = jax.random.normal(ks[9], (N, H), jnp.float32).astype(jnp.bfloat16)
    mailbox = jax.random.normal(ks[10], (N, M, E), jnp.float32).astype(jnp.bfloat16)

    out = node_network_forward(node_feat, node_hidden, mailbox, params)
    out = jax.block_until_ready(out)

    ref = reference_forward(node_feat, node_hidden, mailbox, params)
    np.testing.assert_allclose(np.asarray(out), np.asarray(ref), rtol=1e-5, atol=1e-5)

    print("KERNEL_OK")
</pallas_src>

<mosaic_0001>
module attributes {stable_mosaic.version = 11 : i64} {
  func.func @node_network_kernel(%arg0: i32, %arg1: memref<128x16xbf16, #tpu.memory_space<vmem>>, %arg2: memref<128x16xbf16, #tpu.memory_space<vmem>>, %arg3: memref<128x128xbf16, #tpu.memory_space<vmem>>, %arg4: memref<16x40xf32, #tpu.memory_space<vmem>>, %arg5: memref<16x40xf32, #tpu.memory_space<vmem>>, %arg6: memref<128x40xf32, #tpu.memory_space<vmem>>, %arg7: memref<1x40xf32, #tpu.memory_space<vmem>>, %arg8: memref<40x32xf32, #tpu.memory_space<vmem>>, %arg9: memref<1x32xf32, #tpu.memory_space<vmem>>, %arg10: memref<128x32xf32, #tpu.memory_space<vmem>>) attributes {dimension_semantics = [#tpu.dimension_semantics<parallel>], iteration_bounds = array<i64: 2>, scalar_prefetch = 0 : i64, scratch_operands = 0 : i64, tpu.core_type = #tpu.core_type<tc>, window_params = [{transform_indices = @transform_0, window_bounds = array<i64: 128, 16>}, {transform_indices = @transform_1, window_bounds = array<i64: 128, 16>}, {transform_indices = @transform_2, window_bounds = array<i64: 128, 128>}, {pipeline_mode = #tpu.pipeline_mode<synchronous>, transform_indices = @transform_3, window_bounds = array<i64: 16, 40>}, {pipeline_mode = #tpu.pipeline_mode<synchronous>, transform_indices = @transform_4, window_bounds = array<i64: 16, 40>}, {pipeline_mode = #tpu.pipeline_mode<synchronous>, transform_indices = @transform_5, window_bounds = array<i64: 128, 40>}, {pipeline_mode = #tpu.pipeline_mode<synchronous>, transform_indices = @transform_6, window_bounds = array<i64: 1, 40>}, {pipeline_mode = #tpu.pipeline_mode<synchronous>, transform_indices = @transform_7, window_bounds = array<i64: 40, 32>}, {pipeline_mode = #tpu.pipeline_mode<synchronous>, transform_indices = @transform_8, window_bounds = array<i64: 1, 32>}, {transform_indices = @transform_9, window_bounds = array<i64: 128, 32>}]} {
    %c0 = arith.constant 0 : index
    %c0_0 = arith.constant 0 : index
    %0 = vector.load %arg1[%c0, %c0_0] : memref<128x16xbf16, #tpu.memory_space<vmem>>, vector<128x16xbf16>
    %1 = arith.extf %0 : vector<128x16xbf16> to vector<128x16xf32>
    %c0_1 = arith.constant 0 : index
    %c0_2 = arith.constant 0 : index
    %2 = vector.load %arg2[%c0_1, %c0_2] : memref<128x16xbf16, #tpu.memory_space<vmem>>, vector<128x16xbf16>
    %3 = arith.extf %2 : vector<128x16xbf16> to vector<128x16xf32>
    %c0_3 = arith.constant 0 : index
    %c0_4 = arith.constant 0 : index
    %4 = vector.load %arg3[%c0_3, %c0_4] : memref<128x128xbf16, #tpu.memory_space<vmem>>, vector<128x128xbf16>
    %5 = arith.extf %4 : vector<128x128xbf16> to vector<128x128xf32>
    %c0_5 = arith.constant 0 : index
    %c0_6 = arith.constant 0 : index
    %6 = vector.load %arg4[%c0_5, %c0_6] : memref<16x40xf32, #tpu.memory_space<vmem>>, vector<16x40xf32>
    %cst = arith.constant dense<0.000000e+00> : vector<128x40xf32>
    %7 = tpu.matmul %1, %6, %cst {dimension_numbers = #tpu.dot_dimension_numbers<[1], [0], [0], [1], [0, 0, 1, 1], [], []>} : vector<128x16xf32>, vector<16x40xf32>, vector<128x40xf32> -> vector<128x40xf32>
    %c0_7 = arith.constant 0 : index
    %c0_8 = arith.constant 0 : index
    %8 = vector.load %arg5[%c0_7, %c0_8] : memref<16x40xf32, #tpu.memory_space<vmem>>, vector<16x40xf32>
    %cst_9 = arith.constant dense<0.000000e+00> : vector<128x40xf32>
    %9 = tpu.matmul %3, %8, %cst_9 {dimension_numbers = #tpu.dot_dimension_numbers<[1], [0], [0], [1], [0, 0, 1, 1], [], []>} : vector<128x16xf32>, vector<16x40xf32>, vector<128x40xf32> -> vector<128x40xf32>
    %10 = arith.addf %7, %9 : vector<128x40xf32>
    %c0_10 = arith.constant 0 : index
    %c0_11 = arith.constant 0 : index
    %11 = vector.load %arg6[%c0_10, %c0_11] : memref<128x40xf32, #tpu.memory_space<vmem>>, vector<128x40xf32>
    %cst_12 = arith.constant dense<0.000000e+00> : vector<128x40xf32>
    %12 = tpu.matmul %5, %11, %cst_12 {dimension_numbers = #tpu.dot_dimension_numbers<[1], [0], [0], [1], [0, 0, 1, 1], [], []>} : vector<128x128xf32>, vector<128x40xf32>, vector<128x40xf32> -> vector<128x40xf32>
    %13 = arith.addf %10, %12 : vector<128x40xf32>
    %c0_13 = arith.constant 0 : index
    %c0_14 = arith.constant 0 : index
    %14 = vector.load %arg7[%c0_13, %c0_14] : memref<1x40xf32, #tpu.memory_space<vmem>>, vector<1x40xf32>
    %15 = vector.broadcast %14 : vector<1x40xf32> to vector<128x40xf32>
    %16 = arith.addf %13, %15 : vector<128x40xf32>
    %cst_15 = arith.constant 0.000000e+00 : f32
    %17 = vector.broadcast %cst_15 : f32 to vector<128x40xf32>
    %18 = arith.maximumf %16, %17 : vector<128x40xf32>
    %c0_16 = arith.constant 0 : index
    %c0_17 = arith.constant 0 : index
    %19 = vector.load %arg8[%c0_16, %c0_17] : memref<40x32xf32, #tpu.memory_space<vmem>>, vector<40x32xf32>
    %cst_18 = arith.constant dense<0.000000e+00> : vector<128x32xf32>
    %20 = tpu.matmul %18, %19, %cst_18 {dimension_numbers = #tpu.dot_dimension_numbers<[1], [0], [0], [1], [0, 0, 1, 1], [], []>} : vector<128x40xf32>, vector<40x32xf32>, vector<128x32xf32> -> vector<128x32xf32>
    %c0_19 = arith.constant 0 : index
    %c0_20 = arith.constant 0 : index
    %21 = vector.load %arg9[%c0_19, %c0_20] : memref<1x32xf32, #tpu.memory_space<vmem>>, vector<1x32xf32>
    %22 = vector.broadcast %21 : vector<1x32xf32> to vector<128x32xf32>
    %23 = arith.addf %20, %22 : vector<128x32xf32>
    %24 = math.tanh %23 : vector<128x32xf32>
    %25 = arith.mulf %24, %24 : vector<128x32xf32>
    %cst_21 = arith.constant dense<0.000000e+00> : vector<128xf32>
    %26 = vector.multi_reduction <add>, %25, %cst_21 [1] : vector<128x32xf32> to vector<128xf32>
    %27 = vector.shape_cast %26 : vector<128xf32> to vector<128x1xf32>
    %28 = math.rsqrt %27 : vector<128x1xf32>
    %29 = vector.broadcast %28 : vector<128x1xf32> to vector<128x32xf32>
    %30 = arith.mulf %24, %29 : vector<128x32xf32>
    %c0_22 = arith.constant 0 : index
    %c0_23 = arith.constant 0 : index
    %31 = vector.load %arg10[%c0_22, %c0_23] : memref<128x32xf32, #tpu.memory_space<vmem>>, vector<128x32xf32>
    tpu.vector_store %arg10[%c0_22, %c0_23], %30 {strides = array<i32>} : memref<128x32xf32, #tpu.memory_space<vmem>>, vector<128x32xf32>,
    return
  }
  func.func @transform_0(%arg0: i32) -> (i32, i32) {
    %c0_i32 = arith.constant 0 : i32
    %c0_i32_0 = arith.constant 0 : i32
    return %arg0, %c0_i32 : i32, i32
  }
  func.func @transform_1(%arg0: i32) -> (i32, i32) {
    %c0_i32 = arith.constant 0 : i32
    %c0_i32_0 = arith.constant 0 : i32
    return %arg0, %c0_i32 : i32, i32
  }
  func.func @transform_2(%arg0: i32) -> (i32, i32) {
    %c0_i32 = arith.constant 0 : i32
    %c0_i32_0 = arith.constant 0 : i32
    return %arg0, %c0_i32 : i32, i32
  }
  func.func @transform_3(%arg0: i32) -> (i32, i32) {
    %c0_i32 = arith.constant 0 : i32
    %c0_i32_0 = arith.constant 0 : i32
    %c0_i32_1 = arith.constant 0 : i32
    return %c0_i32, %c0_i32_0 : i32, i32
  }
  func.func @transform_4(%arg0: i32) -> (i32, i32) {
    %c0_i32 = arith.constant 0 : i32
    %c0_i32_0 = arith.constant 0 : i32
    %c0_i32_1 = arith.constant 0 : i32
    return %c0_i32, %c0_i32_0 : i32, i32
  }
  func.func @transform_5(%arg0: i32) -> (i32, i32) {
    %c0_i32 = arith.constant 0 : i32
    %c0_i32_0 = arith.constant 0 : i32
    %c0_i32_1 = arith.constant 0 : i32
    return %c0_i32, %c0_i32_0 : i32, i32
  }
  func.func @transform_6(%arg0: i32) -> (i32, i32) {
    %c0_i32 = arith.constant 0 : i32
    %c0_i32_0 = arith.constant 0 : i32
    %c0_i32_1 = arith.constant 0 : i32
    return %c0_i32, %c0_i32_0 : i32, i32
  }
  func.func @transform_7(%arg0: i32) -> (i32, i32) {
    %c0_i32 = arith.constant 0 : i32
    %c0_i32_0 = arith.constant 0 : i32
    %c0_i32_1 = arith.constant 0 : i32
    return %c0_i32, %c0_i32_0 : i32, i32
  }
  func.func @transform_8(%arg0: i32) -> (i32, i32) {
    %c0_i32 = arith.constant 0 : i32
    %c0_i32_0 = arith.constant 0 : i32
    %c0_i32_1 = arith.constant 0 : i32
    return %c0_i32, %c0_i32_0 : i32, i32
  }
  func.func @transform_9(%arg0: i32) -> (i32, i32) {
    %c0_i32 = arith.constant 0 : i32
    %c0_i32_0 = arith.constant 0 : i32
    return %arg0, %c0_i32 : i32, i32
  }
}

</mosaic_0001>

<bundles_post_ra>
// kernel: tpu_custom_call.1
= control target key start
LH: loop header
LB: loop body
LE: loop exit
PB: predicated region body
PF: predicated region fallthrough
CT: control target
= control target key end

     0   :  { %s2045_s30 = smov 0   ;;  %s2420_s0 = inlined_call_operand.vmem [shape: bf16[256,16], index: 0, kind: input, shape index: {}]   ;;  %s2421_s1 = inlined_call_operand.vmem [shape: bf16[256,16], index: 1, kind: input, shape index: {}]   ;;  %s2422_s2 = inlined_call_operand.vmem [shape: bf16[256,128], index: 2, kind: input, shape index: {}]   ;;  %s2423_s3 = inlined_call_operand.vmem [shape: f32[16,40], index: 3, kind: input, shape index: {}]   ;;  %s2424_s4 = inlined_call_operand.vmem [shape: f32[16,40], index: 4, kind: input, shape index: {}]   ;;  %s2425_s5 = inlined_call_operand.vmem [shape: f32[128,40], index: 5, kind: input, shape index: {}]   ;;  %s2426_s6 = inlined_call_operand.vmem [shape: f32[1,40], index: 6, kind: input, shape index: {}]   ;;  %s2427_s7 = inlined_call_operand.vmem [shape: f32[40,32], index: 7, kind: input, shape index: {}]   ;;  %s2428_s8 = inlined_call_operand.vmem [shape: f32[1,32], index: 8, kind: input, shape index: {}]   ;;  %s2429_s9 = inlined_call_operand.vmem [shape: f32[256,32], index: 9, kind: output, shape index: {}]  }
   0x1 LB: > { %s1498_s10 = sadd.s32 4294967295, %s1993_s30   ;;  %p1502_p0 = scmp.ge.s32.totalorder %s1993_s30, 1  ;;  %s1993_s30 = sphi %s2045_s30, %s19_s30  }
   0x2   : > { %p310_p1 = scmp.lt.s32.totalorder %s1993_s30, 3 }
   0x4   : > { %p311_p2 = pnand %p1502_p0, %p310_p1 }
   0x5   : > { %s1503_s17 = sshll.u32 (!%p311_p2), %s1498_s10, 4 }
   0x6   : > { %314 = sbr.rel (%p311_p2) target bundleno = 651 (0x28b), region = 56  ;;  %p357_p3 = scmp.lt.s32.totalorder (!%p311_p2), %s1503_s17, 31 }
   0xb   : > { %v479_v0 = vld [vmem:[%s2424_s4 + $0x8] sm:$0xff]  ;;  %v478_v2 = vld [vmem:[%s2424_s4] sm:$0xff]  ;;  %v882_v4 = vld [vmem:[%s2425_s5 + $0x78] sm:$0xff]  ;;  %s2431_s17 = smov (!%p357_p3, %s1503_s17), 31  ;;  %vm480_vm0 = vcmask 130048   ;;  %vm1095_vm1 = vcmask 326656  }
   0xc   : > { %v477_v1 = vld [vmem:[%s2423_s3 + $0x8] sm:$0xff]  ;;  %1769 = vmatprep.subr.mxu0 %v479_v0  ;;  %v476_v3 = vld [vmem:[%s2423_s3] sm:$0xff]  ;;  %s2071_s22 = sshll.u32 %s2431_s17, 2  ;;  %v881_v14 = vld [vmem:[%s2425_s5 + $0x70] sm:$0xff]  ;;  %vm1321_vm2 = vcmask 261120  }
   0xd   : > { %1797 = vmatprep.subr.mxu1 %v477_v1  ;;  %1770 = vmatpush3.msra.mxu0 %v479_v0  ;;  %s2077_s25 = scalar_lea.vmem %s2421_s1, %s2071_s22  ;;  %s2084_s28 = scalar_lea.vmem %s2420_s0, %s2071_s22  ;;  %v880_v19 = vld [vmem:[%s2425_s5 + $0x68] sm:$0xff]  ;;  %v879_v22 = vld [vmem:[%s2425_s5 + $0x60] sm:$0xff]  ;;  %v878_v27 = vld [vmem:[%s2425_s5 + $0x58] sm:$0xff] }
   0xe   : > { %1798 = vmatpush3.msra.mxu1 %v477_v1  ;;  %1771 = vmatprep.subr.mxu0 %v478_v2  ;;  %v1596_v5 = vld [vmem:[%s2077_s25] sm:$0xff]   ;;  %v1666_v6 = vld [vmem:[%s2077_s25 + $0x8] sm:$0xff]   ;;  %v1667_v16 = vld [vmem:[%s2077_s25 + $0x10] sm:$0xff]   ;;  %s2161_s18 = scalar_lea.vmem %s2422_s2, %s2071_s22  ;;  %s1510_s22 = sshll.u32 %s2431_s17, 3 }
   0xf   : > { %1799 = vmatprep.subr.mxu1 %v476_v3  ;;  %1772 = vmatpush3.msra.mxu0 %v478_v2  ;;  %v1597_v7 = vunpack.c.l.bf16 %v1596_v5  ;;  %v1598_v8 = vunpack.c.h.bf16 %v1596_v5  ;;  %v1564_v9 = vld [vmem:[%s2084_s28] sm:$0xff]   ;;  %v1659_v10 = vld [vmem:[%s2084_s28 + $0x8] sm:$0xff]   ;;  %v1601_v13 = vunpack.c.l.bf16 %v1666_v6  ;;  %v1602_v17 = vunpack.c.h.bf16 %v1666_v6  ;;  %v1660_v18 = vld [vmem:[%s2084_s28 + $0x10] sm:$0xff]   ;;  %s2367_s23 = scalar_lea.vmem %s2429_s9, %s1510_s22 }
  0x10   : > { %1800 = vmatpush3.msra.mxu1 %v476_v3  ;;  %1825 = vmatprep.subr.mxu0 %v882_v4  ;;  %v1565_v11 = vunpack.c.l.bf16 %v1564_v9  ;;  %v1566_v12 = vunpack.c.h.bf16 %v1564_v9  ;;  %v1569_v15 = vunpack.c.l.bf16 %v1659_v10  ;;  %v1570_v20 = vunpack.c.h.bf16 %v1659_v10  ;;  %v1668_v24 = vld [vmem:[%s2077_s25 + $0x18] sm:$0xff]   ;;  %v877_v30 = vld [vmem:[%s2425_s5 + $0x50] sm:$0xff]  ;;  %v1669_v32 = vld [vmem:[%s2077_s25 + $0x20] sm:$0xff]  }
  0x11   : > { %1773 = vmatprep.mubr.msk.f32.mxu0 %vm480_vm0, %v1597_v7  ;;  %v1605_v21 = vunpack.c.l.bf16 %v1667_v16  ;;  %v1573_v23 = vunpack.c.l.bf16 %v1660_v18  ;;  %v1606_v25 = vunpack.c.h.bf16 %v1667_v16  ;;  %v1661_v26 = vld [vmem:[%s2084_s28 + $0x18] sm:$0xff]   ;;  %v1574_v28 = vunpack.c.h.bf16 %v1660_v18  ;;  %v1662_v34 = vld [vmem:[%s2084_s28 + $0x20] sm:$0xff]   ;;  %v876_v35 = vld [vmem:[%s2425_s5 + $0x48] sm:$0xff] }
  0x12   : > { %1801 = vmatprep.mubr.msk.f32.mxu1 %vm480_vm0, %v1565_v11  ;;  %1774 = vmatmul.mubr.msk.f32.vlgmr.msra.gmra.mxu0 %vm480_vm0, %v1598_v8  ;;  %v1609_v29 = vunpack.c.l.bf16 %v1668_v24  ;;  %v1577_v31 = vunpack.c.l.bf16 %v1661_v26  ;;  %v1610_v33 = vunpack.c.h.bf16 %v1668_v24  ;;  %v1578_v36 = vunpack.c.h.bf16 %v1661_v26  ;;  %v875_v38 = vld [vmem:[%s2425_s5 + $0x40] sm:$0xff]  ;;  %v1670_v40 = vld [vmem:[%s2077_s25 + $0x28] sm:$0xff]   ;;  %v874_v43 = vld [vmem:[%s2425_s5 + $0x38] sm:$0xff] }
  0x13   : > { %1802 = vmatmul.mubr.msk.f32.vlgmr.msra.gmra.mxu1 %vm480_vm0, %v1566_v12  ;;  %1826 = vmatpush3.msra.mxu0 %v882_v4  ;;  %v1613_v37 = vunpack.c.l.bf16 %v1669_v32  ;;  %v1581_v39 = vunpack.c.l.bf16 %v1662_v34  ;;  %v1614_v41 = vunpack.c.h.bf16 %v1669_v32  ;;  %v1663_v42 = vld [vmem:[%s2084_s28 + $0x28] sm:$0xff]   ;;  %v1582_v44 = vunpack.c.h.bf16 %v1662_v34  ;;  %v873_v46 = vld [vmem:[%s2425_s5 + $0x30] sm:$0xff]  ;;  %v871_v54 = vld [vmem:[%s2425_s5 + $0x20] sm:$0xff] }
  0x14   : > { %1827 = vmatprep.subr.mxu0 %v881_v14  ;;  %1776 = vmatprep.mubr.msk.f32.mxu0 %vm480_vm0, %v1601_v13  ;;  %v1617_v45 = vunpack.c.l.bf16 %v1670_v40  ;;  %v1585_v47 = vunpack.c.l.bf16 %v1663_v42  ;;  %v1671_v48 = vld [vmem:[%s2077_s25 + $0x30] sm:$0xff]   ;;  %v1618_v49 = vunpack.c.h.bf16 %v1670_v40  ;;  %v872_v51 = vld [vmem:[%s2425_s5 + $0x28] sm:$0xff]  ;;  %v1586_v52 = vunpack.c.h.bf16 %v1663_v42  ;;  %v1672_v56 = vld [vmem:[%s2077_s25 + $0x38] sm:$0xff]  }
  0x15   : > { %1828 = vmatpush3.msra.mxu0 %v881_v14  ;;  %1804 = vmatprep.mubr.msk.f32.mxu1 %vm480_vm0, %v1569_v15  ;;  %v1664_v50 = vld [vmem:[%s2084_s28 + $0x30] sm:$0xff]   ;;  %v1621_v53 = vunpack.c.l.bf16 %v1671_v48  ;;  %v1622_v57 = vunpack.c.h.bf16 %v1671_v48  ;;  %v1665_v58 = vld [vmem:[%s2084_s28 + $0x38] sm:$0xff]   ;;  %v1625_v61 = vunpack.c.l.bf16 %v1672_v56  ;;  %v1628_v0 = vld [vmem:[%s2161_s18] sm:$0xff]   ;;  %v1626_v1 = vunpack.c.h.bf16 %v1672_v56 }
  0x16   : > { %1829 = vmatprep.subr.mxu0 %v880_v19  ;;  %1777 = vmatmul.mubr.msk.f32.gmra.mxu0 %vm480_vm0, %v1602_v17  ;;  %v1589_v55 = vunpack.c.l.bf16 %v1664_v50  ;;  %v870_v59 = vld [vmem:[%s2425_s5 + $0x18] sm:$0xff]  ;;  %v1590_v60 = vunpack.c.h.bf16 %v1664_v50  ;;  %v869_v62 = vld [vmem:[%s2425_s5 + $0x10] sm:$0xff]  ;;  %v1593_v63 = vunpack.c.l.bf16 %v1665_v58  ;;  %v868_v2 = vld [vmem:[%s2425_s5 + $0x8] sm:$0xff]  ;;  %v1594_v3 = vunpack.c.h.bf16 %v1665_v58 }
  0x17   : > { %1805 = vmatmul.mubr.msk.f32.gmra.mxu1 %vm480_vm0, %v1570_v20  ;;  %1830 = vmatpush3.msra.mxu0 %v880_v19  ;;  %v1629_v4 = vunpack.c.l.bf16 %v1628_v0  ;;  %v1673_v5 = vld [vmem:[%s2161_s18 + $0x8] sm:$0xff]   ;;  %v867_v6 = vld [vmem:[%s2425_s5] sm:$0xff]  ;;  %v1630_v7 = vunpack.c.h.bf16 %v1628_v0  ;;  %v1674_v9 = vld [vmem:[%s2161_s18 + $0x10] sm:$0xff]  }
  0x18   : > { %1831 = vmatprep.subr.mxu0 %v879_v22  ;;  %1779 = vmatprep.mubr.msk.f32.mxu0 %vm480_vm0, %v1605_v21  ;;  %v1633_v8 = vunpack.c.l.bf16 %v1673_v5  ;;  %v1634_v10 = vunpack.c.h.bf16 %v1673_v5  ;;  %v1637_v11 = vunpack.c.l.bf16 %v1674_v9  ;;  %v1675_v12 = vld [vmem:[%s2161_s18 + $0x18] sm:$0xff]   ;;  %v1638_v13 = vunpack.c.h.bf16 %v1674_v9  ;;  %v1676_v15 = vld [vmem:[%s2161_s18 + $0x20] sm:$0xff]   ;;  %v1677_v18 = vld [vmem:[%s2161_s18 + $0x28] sm:$0xff]  }
  0x19   : > { %1832 = vmatpush3.msra.mxu0 %v879_v22  ;;  %1807 = vmatprep.mubr.msk.f32.mxu1 %vm480_vm0, %v1573_v23  ;;  %v1641_v14 = vunpack.c.l.bf16 %v1675_v12  ;;  %v1642_v16 = vunpack.c.h.bf16 %v1675_v12  ;;  %v1645_v17 = vunpack.c.l.bf16 %v1676_v15  ;;  %v1646_v19 = vunpack.c.h.bf16 %v1676_v15  ;;  %v1678_v21 = vld [vmem:[%s2161_s18 + $0x30] sm:$0xff]   ;;  %v1679_v24 = vld [vmem:[%s2161_s18 + $0x38] sm:$0xff]   ;;  %v1083_v32 = vld [vmem:[%s2427_s7] sm:$0xff] }
  0x1a   : > { %1833 = vmatprep.subr.mxu0 %v878_v27  ;;  %1780 = vmatmul.mubr.msk.f32.gmra.mxu0 %vm480_vm0, %v1606_v25  ;;  %v1649_v20 = vunpack.c.l.bf16 %v1677_v18  ;;  %v1650_v22 = vunpack.c.h.bf16 %v1677_v18  ;;  %v1653_v23 = vunpack.c.l.bf16 %v1678_v21  ;;  %v1654_v25 = vunpack.c.h.bf16 %v1678_v21 }
  0x1b   : > { %1808 = vmatmul.mubr.msk.f32.gmra.mxu1 %vm480_vm0, %v1574_v28  ;;  %1834 = vmatpush3.msra.mxu0 %v878_v27  ;;  %v1657_v26 = vunpack.c.l.bf16 %v1679_v24  ;;  %v1658_v27 = vunpack.c.h.bf16 %v1679_v24  ;;  %v1087_v28 = vld [vmem:[%s2427_s7 + $0x20] sm:$0xff] }
  0x1c   : > { %1835 = vmatprep.subr.mxu0 %v877_v30  ;;  %1782 = vmatprep.mubr.msk.f32.mxu0 %vm480_vm0, %v1609_v29  ;;  %v1086_v29 = vld [vmem:[%s2427_s7 + $0x18] sm:$0xff] }
  0x1d   : > { %1836 = vmatpush3.msra.mxu0 %v877_v30  ;;  %1810 = vmatprep.mubr.msk.f32.mxu1 %vm480_vm0, %v1577_v31  ;;  %v1085_v30 = vld [vmem:[%s2427_s7 + $0x10] sm:$0xff]  ;;  %v1084_v31 = vld [vmem:[%s2427_s7 + $0x8] sm:$0xff] }
  0x1e   : > { %1837 = vmatprep.subr.mxu0 %v876_v35  ;;  %1783 = vmatmul.mubr.msk.f32.gmra.mxu0 %vm480_vm0, %v1610_v33 }
  0x1f   : > { %1811 = vmatmul.mubr.msk.f32.gmra.mxu1 %vm480_vm0, %v1578_v36  ;;  %1838 = vmatpush3.msra.mxu0 %v876_v35 }
  0x20   : > { %1839 = vmatprep.subr.mxu0 %v875_v38  ;;  %1785 = vmatprep.mubr.msk.f32.mxu0 %vm480_vm0, %v1613_v37 }
  0x21   : > { %1840 = vmatpush3.msra.mxu0 %v875_v38  ;;  %1813 = vmatprep.mubr.msk.f32.mxu1 %vm480_vm0, %v1581_v39 }
  0x22   : > { %1841 = vmatprep.subr.mxu0 %v874_v43  ;;  %1786 = vmatmul.mubr.msk.f32.gmra.mxu0 %vm480_vm0, %v1614_v41 }
  0x23   : > { %1814 = vmatmul.mubr.msk.f32.gmra.mxu1 %vm480_vm0, %v1582_v44  ;;  %1842 = vmatpush3.msra.mxu0 %v874_v43 }
  0x24   : > { %1843 = vmatprep.subr.mxu0 %v873_v46  ;;  %1788 = vmatprep.mubr.msk.f32.mxu0 %vm480_vm0, %v1617_v45 }
  0x25   : > { %1844 = vmatpush3.msra.mxu0 %v873_v46  ;;  %1816 = vmatprep.mubr.msk.f32.mxu1 %vm480_vm0, %v1585_v47 }
  0x26   : > { %1845 = vmatprep.subr.mxu0 %v872_v51  ;;  %1789 = vmatmul.mubr.msk.f32.gmra.mxu0 %vm480_vm0, %v1618_v49 }
  0x27   : > { %1817 = vmatmul.mubr.msk.f32.gmra.mxu1 %vm480_vm0, %v1586_v52  ;;  %1846 = vmatpush3.msra.mxu0 %v872_v51 }
  0x28   : > { %1847 = vmatprep.subr.mxu0 %v871_v54  ;;  %1791 = vmatprep.mubr.msk.f32.mxu0 %vm480_vm0, %v1621_v53 }
  0x29   : > { %1848 = vmatpush3.msra.mxu0 %v871_v54  ;;  %1819 = vmatprep.mubr.msk.f32.mxu1 %vm480_vm0, %v1589_v55 }
  0x2a   : > { %1849 = vmatprep.subr.mxu0 %v870_v59  ;;  %1792 = vmatmul.mubr.msk.f32.gmra.mxu0 %vm480_vm0, %v1622_v57 }
  0x2b   : > { %1820 = vmatmul.mubr.msk.f32.gmra.mxu1 %vm480_vm0, %v1590_v60  ;;  %1850 = vmatpush3.msra.mxu0 %v870_v59 }
  0x2c   : > { %1851 = vmatprep.subr.mxu0 %v869_v62  ;;  %1794 = vmatprep.mubr.msk.f32.mxu0 %vm480_vm0, %v1625_v61 }
  0x2d   : > { %1852 = vmatpush3.msra.mxu0 %v869_v62  ;;  %1822 = vmatprep.mubr.msk.f32.mxu1 %vm480_vm0, %v1593_v63  ;;  %v2222_v62 = vld [vmem:[%s2426_s6] ss:$0 sm:$0xff] }
  0x2e   : > { %1853 = vmatprep.subr.mxu0 %v868_v2  ;;  %1795 = vmatmul.mubr.msk.f32.gmra.mxu0 %vm480_vm0, %v1626_v1 }
  0x2f   : > { %1823 = vmatmul.mubr.msk.f32.gmra.mxu1 %vm480_vm0, %v1594_v3  ;;  %1854 = vmatpush3.msra.mxu0 %v868_v2 }
  0x30   : > { %1855 = vmatprep.subr.mxu0 %v867_v6  ;;  %1857 = vmatprep.mubr.f32.mxu0 %v1629_v4 }
  0x31   : > { %1856 = vmatpush3.msra.mxu0 %v867_v6  ;;  %1881 = vmatprep.subr.mxu1 %v1087_v28 }
  0x32   : > { %1858 = vmatmul.mubr.f32.vlgmr.msra.gmra.mxu0 %v1630_v7  ;;  %1882 = vmatpush3.msra.mxu1 %v1087_v28 }
  0x33   : > { %1860 = vmatprep.mubr.f32.mxu0 %v1633_v8  ;;  %1883 = vmatprep.subr.mxu1 %v1086_v29 }
  0x34   : > { %1884 = vmatpush3.msra.mxu1 %v1086_v29 }
  0x35   : > { %1885 = vmatprep.subr.mxu1 %v1085_v30 }
  0x36   : > { %1861 = vmatmul.mubr.f32.gmra.mxu0 %v1634_v10  ;;  %1886 = vmatpush3.msra.mxu1 %v1085_v30 }
  0x37   : > { %1863 = vmatprep.mubr.f32.mxu0 %v1637_v11  ;;  %1887 = vmatprep.subr.mxu1 %v1084_v31 }
  0x38   : > { %1888 = vmatpush3.msra.mxu1 %v1084_v31 }
  0x39   : > { %1889 = vmatprep.subr.mxu1 %v1083_v32 }
  0x3a   : > { %1864 = vmatmul.mubr.f32.gmra.mxu0 %v1638_v13  ;;  %1890 = vmatpush3.msra.mxu1 %v1083_v32 }
  0x3b   : > { %1866 = vmatprep.mubr.f32.mxu0 %v1641_v14 }
  0x3e   : > { %1867 = vmatmul.mubr.f32.gmra.mxu0 %v1642_v16 }
  0x3f   : > { %1869 = vmatprep.mubr.f32.mxu0 %v1645_v17 }
  0x42   : > { %1870 = vmatmul.mubr.f32.gmra.mxu0 %v1646_v19 }
  0x43   : > { %1872 = vmatprep.mubr.f32.mxu0 %v1649_v20 }
  0x46   : > { %1873 = vmatmul.mubr.f32.gmra.mxu0 %v1650_v22 }
  0x47   : > { %1875 = vmatprep.mubr.f32.mxu0 %v1653_v23 }
  0x4a   : > { %1876 = vmatmul.mubr.f32.gmra.mxu0 %v1654_v25 }
  0x4b   : > { %1878 = vmatprep.mubr.f32.mxu0 %v1657_v26 }
  0x4e   : > { %1879 = vmatmul.mubr.f32.gmra.mxu0 %v1658_v27 }
  0xd2   : > { %v1775_v33 = vpop.f32.mrf.mxu0 }
  0xd3   : > { %v1803_v34 = vpop.f32.mrf.mxu1 }
  0xd4   : > { %v595_v35 = vpop.f32.mrf.mxu0  ;;  %v794_v58 = vadd.f32 %v1803_v34, %v1775_v33 }
  0xd5   : > { %v788_v36 = vpop.f32.mrf.mxu1 }
  0xd6   : > { %v1778_v37 = vpop.f32.mrf.mxu0  ;;  %v789_v60 = vadd.f32 %v788_v36, %v595_v35 }
  0xd7   : > { %v1806_v38 = vpop.f32.mrf.mxu1 }
  0xd8   : > { %v605_v39 = vpop.f32.mrf.mxu0  ;;  %v804_v1 = vadd.f32 %v1806_v38, %v1778_v37 }
  0xd9   : > { %v798_v41 = vpop.f32.mrf.mxu1 }
  0xda   : > { %v1781_v40 = vpop.f32.mrf.mxu0  ;;  %v799_v5 = vadd.f32 %v798_v41, %v605_v39 }
  0xdb   : > { %v1809_v44 = vpop.f32.mrf.mxu1 }
  0xdc   : > { %v615_v42 = vpop.f32.mrf.mxu0  ;;  %v814_v10 = vadd.f32 %v1809_v44, %v1781_v40 }
  0xdd   : > { %v808_v47 = vpop.f32.mrf.mxu1 }
  0xde   : > { %v1784_v43 = vpop.f32.mrf.mxu0  ;;  %v809_v16 = vadd.f32 %v808_v47, %v615_v42 }
  0xdf   : > { %v1812_v50 = vpop.f32.mrf.mxu1 }
  0xe0   : > { %v625_v45 = vpop.f32.mrf.mxu0  ;;  %v824_v21 = vadd.f32 %v1812_v50, %v1784_v43 }
  0xe1   : > { %v818_v53 = vpop.f32.mrf.mxu1 }
  0xe2   : > { %v1787_v46 = vpop.f32.mrf.mxu0  ;;  %v819_v27 = vadd.f32 %v818_v53, %v625_v45 }
  0xe3   : > { %v1815_v56 = vpop.f32.mrf.mxu1 }
  0xe4   : > { %v635_v48 = vpop.f32.mrf.mxu0  ;;  %v834_v32 = vadd.f32 %v1815_v56, %v1787_v46 }
  0xe5   : > { %v828_v63 = vpop.f32.mrf.mxu1 }
  0xe6   : > { %v2207_v49 = vpop.f32.mrf.mxu0  ;;  %v829_v38 = vadd.f32 %v828_v63, %v635_v48 }
  0xe7   : > { %v1818_v8 = vpop.f32.mrf.mxu1 }
  0xe8   : > { %v2209_v51 = vpop.f32.mrf.mxu0  ;;  %v844_v43 = vadd.f32 %v1818_v8, %v2207_v49 }
  0xe9   : > { %v838_v19 = vpop.f32.mrf.mxu1 }
  0xea   : > { %v2211_v52 = vpop.f32.mrf.mxu0  ;;  %v839_v53 = vadd.f32 %v838_v19, %v2209_v51  ;;  %v2265_v19 = vld [vmem:[%s2428_s8] ss:$0 sm:$0xff] }
  0xeb   : > { %v1821_v30 = vpop.f32.mrf.mxu1 }
  0xec   : > { %v2213_v54 = vpop.f32.mrf.mxu0 }
  0xed   : > { %v848_v41 = vpop.f32.mrf.mxu1 }
  0xee   : > { %v2215_v55 = vpop.f32.mrf.mxu0 }
  0xf0   : > { %v2217_v57 = vpop.f32.mrf.mxu0 }
  0xf2   : > { %v1859_v59 = vpop.f32.mrf.mxu0 }
  0xf3   : > { %v1029_v61 = vadd.f32 %v1859_v59, %v794_v58  ;;  %v1824_v58 = vpop.f32.mrf.mxu1 }
  0xf4   : > { %v949_v0 = vpop.f32.mrf.mxu0 }
  0xf5   : > { %v1028_v2 = vadd.f32 %v949_v0, %v789_v60  ;;  %v1052_v3 = vadd.f32 %v2222_v62, %v1029_v61  ;;  %v854_v60 = vadd.f32 %v1821_v30, %v2211_v52 }
  0xf6   : > { %v1862_v4 = vpop.f32.mrf.mxu0 }
  0xf7   : > { %v1051_v6 = vadd.f32 %v2222_v62, %v1028_v2  ;;  %v1031_v7 = vadd.f32 %v1862_v4, %v804_v1  ;;  %v1068_v13 = vmax.f32 %v1052_v3, 0.0  ;;  %v849_v2 = vadd.f32 %v848_v41, %v2213_v54  ;;  %v858_v4 = vpop.f32.mrf.mxu1 }
  0xf8   : > { %v959_v9 = vpop.f32.mrf.mxu0 }
  0xf9   : > { %v1067_v11 = vmax.f32 %v1051_v6, 0.0  ;;  %v1030_v12 = vadd.f32 %v959_v9, %v799_v5  ;;  %v1054_v14 = vadd.f32 %v2222_v62, %v1031_v7  ;;  %v864_v6 = vadd.f32 %v1824_v58, %v2215_v55 }
  0xfa   : > { %v1865_v15 = vpop.f32.mrf.mxu0 }
  0xfb   : > { %v1053_v17 = vadd.f32 %v2222_v62, %v1030_v12  ;;  %v1033_v18 = vadd.f32 %v1865_v15, %v814_v10  ;;  %1891 = vmatprep.mubr.msk.f32.mxu1 %vm1095_vm1, %v1067_v11  ;;  %v1070_v24 = vmax.f32 %v1054_v14, 0.0  ;;  %v859_v11 = vadd.f32 %v858_v4, %v2217_v57 }
  0xfc   : > { %v969_v20 = vpop.f32.mrf.mxu0  ;;  %1892 = vmatmul.mubr.msk.f32.vlgmr.msra.gmra.mxu1 %vm1095_vm1, %v1068_v13 }
  0xfd   : > { %v1069_v22 = vmax.f32 %v1053_v17, 0.0  ;;  %v1032_v23 = vadd.f32 %v969_v20, %v809_v16  ;;  %v1056_v25 = vadd.f32 %v2222_v62, %v1033_v18 }
  0xfe   : > { %v1868_v26 = vpop.f32.mrf.mxu0 }
  0xff   : > { %v1055_v28 = vadd.f32 %v2222_v62, %v1032_v23  ;;  %v1035_v29 = vadd.f32 %v1868_v26, %v824_v21  ;;  %1894 = vmatprep.mubr.msk.f32.mxu1 %vm1095_vm1, %v1069_v22  ;;  %v1072_v35 = vmax.f32 %v1056_v25, 0.0 }
 0x100   : > { %v979_v31 = vpop.f32.mrf.mxu0  ;;  %1895 = vmatmul.mubr.msk.f32.gmra.mxu1 %vm1095_vm1, %v1070_v24 }
 0x101   : > { %v1071_v33 = vmax.f32 %v1055_v28, 0.0  ;;  %v1034_v34 = vadd.f32 %v979_v31, %v819_v27  ;;  %v1058_v36 = vadd.f32 %v2222_v62, %v1035_v29 }
 0x102   : > { %v1871_v37 = vpop.f32.mrf.mxu0 }
 0x103   : > { %v1057_v39 = vadd.f32 %v2222_v62, %v1034_v34  ;;  %v1037_v40 = vadd.f32 %v1871_v37, %v834_v32  ;;  %1897 = vmatprep.mubr.msk.f32.mxu1 %vm1095_vm1, %v1071_v33  ;;  %v1074_v46 = vmax.f32 %v1058_v36, 0.0 }
 0x104   : > { %v989_v42 = vpop.f32.mrf.mxu0  ;;  %1898 = vmatmul.mubr.msk.f32.gmra.mxu1 %vm1095_vm1, %v1072_v35 }
 0x105   : > { %v1073_v44 = vmax.f32 %v1057_v39, 0.0  ;;  %v1036_v45 = vadd.f32 %v989_v42, %v829_v38  ;;  %v1060_v47 = vadd.f32 %v2222_v62, %v1037_v40 }
 0x106   : > { %v1874_v50 = vpop.f32.mrf.mxu0 }
 0x107   : > { %v1059_v48 = vadd.f32 %v2222_v62, %v1036_v45  ;;  %v1039_v56 = vadd.f32 %v1874_v50, %v844_v43  ;;  %1900 = vmatprep.mubr.msk.f32.mxu1 %vm1095_vm1, %v1073_v44  ;;  %v1076_v63 = vmax.f32 %v1060_v47, 0.0 }
 0x108   : > { %v999_v59 = vpop.f32.mrf.mxu0  ;;  %1901 = vmatmul.mubr.msk.f32.gmra.mxu1 %vm1095_vm1, %v1074_v46 }
 0x109   : > { %v1075_v49 = vmax.f32 %v1059_v48, 0.0  ;;  %v1038_v61 = vadd.f32 %v999_v59, %v839_v53  ;;  %v1062_v0 = vadd.f32 %v2222_v62, %v1039_v56 }
 0x10a   : > { %v1877_v1 = vpop.f32.mrf.mxu0 }
 0x10b   : > { %v1061_v51 = vadd.f32 %v2222_v62, %v1038_v61  ;;  %v1041_v3 = vadd.f32 %v1877_v1, %v854_v60  ;;  %1903 = vmatprep.mubr.msk.f32.mxu1 %vm1095_vm1, %v1075_v49  ;;  %v1078_v8 = vmax.f32 %v1062_v0, 0.0 }
 0x10c   : > { %v1009_v5 = vpop.f32.mrf.mxu0  ;;  %1904 = vmatmul.mubr.msk.f32.gmra.mxu1 %vm1095_vm1, %v1076_v63 }
 0x10d   : > { %v1077_v52 = vmax.f32 %v1061_v51, 0.0  ;;  %v1040_v7 = vadd.f32 %v1009_v5, %v849_v2  ;;  %v1064_v9 = vadd.f32 %v2222_v62, %v1041_v3 }
 0x10e   : > { %v1880_v10 = vpop.f32.mrf.mxu0 }
 0x10f   : > { %v1063_v54 = vadd.f32 %v2222_v62, %v1040_v7  ;;  %v1043_v12 = vadd.f32 %v1880_v10, %v864_v6  ;;  %1906 = vmatprep.mubr.msk.f32.mxu1 %vm1095_vm1, %v1077_v52  ;;  %v1080_v16 = vmax.f32 %v1064_v9, 0.0 }
 0x110   : > { %v1019_v13 = vpop.f32.mrf.mxu0  ;;  %1907 = vmatmul.mubr.msk.f32.gmra.mxu1 %vm1095_vm1, %v1078_v8 }
 0x111   : > { %v1079_v14 = vmax.f32 %v1063_v54, 0.0  ;;  %v1042_v15 = vadd.f32 %v1019_v13, %v859_v11  ;;  %v1066_v55 = vadd.f32 %v2222_v62, %v1043_v12 }
 0x113   : > { %v1065_v17 = vadd.f32 %v2222_v62, %v1042_v15  ;;  %1909 = vmatprep.mubr.msk.f32.mxu1 %vm1095_vm1, %v1079_v14  ;;  %v1082_v18 = vmax.f32 %v1066_v55, 0.0 }
 0x114   : > { %1910 = vmatmul.mubr.msk.f32.gmra.mxu1 %vm1095_vm1, %v1080_v16 }
 0x115   : > { %v1081_v57 = vmax.f32 %v1065_v17, 0.0 }
 0x117   : > { %1912 = vmatprep.mubr.msk.f32.mxu1 %vm1095_vm1, %v1081_v57 }
 0x118   : > { %1913 = vmatmul.mubr.msk.f32.gmra.mxu1 %vm1095_vm1, %v1082_v18 }
 0x1bc   : > { %v1893_v20 = vpop.f32.mrf.mxu1 }
 0x1bd   : > { %v1216_v21 = vadd.f32 %v1893_v20, %v2265_v19 }
 0x1be   : > { %v1210_v22 = vpop.f32.mrf.mxu1 }
 0x1bf   : > { %1923 = vtanh.f32 %v1216_v21  ;;  %v1211_v62 = vadd.f32 %v2265_v19, %v1210_v22 }
 0x1c0   : > { %v1896_v23 = vpop.f32.mrf.mxu1 }
 0x1c1   : > { %1925 = vtanh.f32 %v1211_v62  ;;  %v1226_v24 = vadd.f32 %v1896_v23, %v2265_v19 }
 0x1c2   : > { %v1220_v25 = vpop.f32.mrf.mxu1 }
 0x1c3   : > { %1927 = vtanh.f32 %v1226_v24  ;;  %v1221_v26 = vadd.f32 %v2265_v19, %v1220_v25 }
 0x1c4   : > { %v1899_v27 = vpop.f32.mrf.mxu1 }
 0x1c5   : > { %1929 = vtanh.f32 %v1221_v26  ;;  %v1236_v28 = vadd.f32 %v1899_v27, %v2265_v19 }
 0x1c6   : > { %v1230_v29 = vpop.f32.mrf.mxu1 }
 0x1c7   : > { %1931 = vtanh.f32 %v1236_v28  ;;  %v1231_v30 = vadd.f32 %v2265_v19, %v1230_v29 }
 0x1c8   : > { %v1902_v31 = vpop.f32.mrf.mxu1 }
 0x1c9   : > { %1933 = vtanh.f32 %v1231_v30  ;;  %v1246_v32 = vadd.f32 %v1902_v31, %v2265_v19 }
 0x1ca   : > { %v1240_v33 = vpop.f32.mrf.mxu1 }
 0x1cb   : > { %1935 = vtanh.f32 %v1246_v32  ;;  %v1241_v34 = vadd.f32 %v2265_v19, %v1240_v33 }
 0x1cc   : > { %v2275_v35 = vpop.eup %1923  ;;  %v1905_v36 = vpop.f32.mrf.mxu1 }
 0x1cd   : > { %1937 = vtanh.f32 %v1241_v34  ;;  %v1256_v37 = vadd.f32 %v1905_v36, %v2265_v19  ;;  %v1306_v38 = vmul.f32 %v2275_v35, %v2275_v35 }
 0x1ce   : > { %v2280_v39 = vpop.eup %1925  ;;  %v1250_v40 = vpop.f32.mrf.mxu1 }
 0x1cf   : > { %1939 = vtanh.f32 %v1256_v37  ;;  %v1251_v41 = vadd.f32 %v2265_v19, %v1250_v40  ;;  %v1325_v42 = vsel %vm1321_vm2, %v1306_v38, 0.0  ;;  %v1305_v43 = vmul.f32 %v2280_v39, %v2280_v39 }
 0x1d0   : > { %v2286_v44 = vpop.eup %1927  ;;  %1326 = vadd.xlane.f32.xlu0 %v1325_v42  ;;  %v1908_v45 = vpop.f32.mrf.mxu1 }
 0x1d1   : > { %1941 = vtanh.f32 %v1251_v41  ;;  %v1266_v46 = vadd.f32 %v1908_v45, %v2265_v19  ;;  %v1308_v47 = vmul.f32 %v2286_v44, %v2286_v44  ;;  %v1322_v48 = vsel %vm1321_vm2, %v1305_v43, 0.0 }
 0x1d2   : > { %v2291_v50 = vpop.eup %1929  ;;  %v1260_v53 = vpop.f32.mrf.mxu1 }
 0x1d3   : > { %1943 = vtanh.f32 %v1266_v46  ;;  %v1261_v56 = vadd.f32 %v2265_v19, %v1260_v53  ;;  %v1331_v58 = vsel %vm1321_vm2, %v1308_v47, 0.0  ;;  %v1307_v59 = vmul.f32 %v2291_v50, %v2291_v50 }
 0x1d4   : > { %v2298_v60 = vpop.eup %1931  ;;  %1332 = vadd.xlane.f32.xlu1 %v1331_v58  ;;  %v1911_v49 = vpop.f32.mrf.mxu1  ;;  %1323 = vadd.xlane.f32.xlu0 %v1322_v48 }
 0x1d5   : > { %1945 = vtanh.f32 %v1261_v56  ;;  %v1276_v61 = vadd.f32 %v1911_v49, %v2265_v19  ;;  %v1310_v1 = vmul.f32 %v2298_v60, %v2298_v60  ;;  %v1328_v51 = vsel %vm1321_vm2, %v1307_v59, 0.0 }
 0x1d6   : > { %v2301_v63 = vpop.eup %1933  ;;  %v1270_v0 = vpop.f32.mrf.mxu1 }
 0x1d7   : > { %1947 = vtanh.f32 %v1276_v61  ;;  %v1271_v2 = vadd.f32 %v2265_v19, %v1270_v0  ;;  %v1309_v3 = vmul.f32 %v2301_v63, %v2301_v63  ;;  %v1337_v9 = vsel %vm1321_vm2, %v1310_v1, 0.0 }
 0x1d8   : > { %v2309_v4 = vpop.eup %1935  ;;  %v1914_v5 = vpop.f32.mrf.mxu1  ;;  %1329 = vadd.xlane.f32.xlu1 %v1328_v51 }
 0x1d9   : > { %1949 = vtanh.f32 %v1271_v2  ;;  %v1286_v6 = vadd.f32 %v1914_v5, %v2265_v19  ;;  %v1334_v52 = vsel %vm1321_vm2, %v1309_v3, 0.0  ;;  %v1312_v54 = vmul.f32 %v2309_v4, %v2309_v4 }
 0x1da   : > { %v2313_v7 = vpop.eup %1937  ;;  %v1280_v8 = vpop.f32.mrf.mxu1  ;;  %1335 = vadd.xlane.f32.xlu0 %v1334_v52 }
 0x1db   : > { %1951 = vtanh.f32 %v1286_v6  ;;  %v1281_v10 = vadd.f32 %v2265_v19, %v1280_v8  ;;  %v1311_v11 = vmul.f32 %v2313_v7, %v2313_v7  ;;  %v1343_v15 = vsel %vm1321_vm2, %v1312_v54, 0.0 }
 0x1dc   : > { %v2321_v12 = vpop.eup %1939  ;;  %1338 = vadd.xlane.f32.xlu1 %v1337_v9 }
 0x1dd   : > { %1953 = vtanh.f32 %v1281_v10  ;;  %v1340_v13 = vsel %vm1321_vm2, %v1311_v11, 0.0  ;;  %v1314_v55 = vmul.f32 %v2321_v12, %v2321_v12 }
 0x1de   : > { %v2324_v14 = vpop.eup %1941  ;;  %1341 = vadd.xlane.f32.xlu0 %v1340_v13 }
 0x1df   : > { %v1313_v16 = vmul.f32 %v2324_v14, %v2324_v14  ;;  %v1349_v19 = vsel %vm1321_vm2, %v1314_v55, 0.0 }
 0x1e0   : > { %v2331_v17 = vpop.eup %1943  ;;  %1344 = vadd.xlane.f32.xlu1 %v1343_v15 }
 0x1e1   : > { %v1346_v57 = vsel %vm1321_vm2, %v1313_v16, 0.0  ;;  %v1316_v21 = vmul.f32 %v2331_v17, %v2331_v17 }
 0x1e2   : > { %v2334_v18 = vpop.eup %1945  ;;  %1347 = vadd.xlane.f32.xlu0 %v1346_v57 }
 0x1e3   : > { %v1315_v20 = vmul.f32 %v2334_v18, %v2334_v18  ;;  %v1355_v24 = vsel %vm1321_vm2, %v1316_v21, 0.0 }
 0x1e4   : > { %v2341_v22 = vpop.eup %1947  ;;  %1350 = vadd.xlane.f32.xlu1 %v1349_v19 }
 0x1e5   : > { %v1352_v62 = vsel %vm1321_vm2, %v1315_v20, 0.0  ;;  %v1318_v26 = vmul.f32 %v2341_v22, %v2341_v22 }
 0x1e6   : > { %v2344_v23 = vpop.eup %1949  ;;  %1353 = vadd.xlane.f32.xlu0 %v1352_v62 }
 0x1e7   : > { %v1317_v25 = vmul.f32 %v2344_v23, %v2344_v23  ;;  %v1361_v30 = vsel %vm1321_vm2, %v1318_v26, 0.0 }
 0x1e8   : > { %v2351_v27 = vpop.eup %1951  ;;  %1356 = vadd.xlane.f32.xlu1 %v1355_v24 }
 0x1e9   : > { %v1358_v28 = vsel %vm1321_vm2, %v1317_v25, 0.0  ;;  %v1320_v32 = vmul.f32 %v2351_v27, %v2351_v27 }
 0x1ea   : > { %v2354_v29 = vpop.eup %1953  ;;  %1359 = vadd.xlane.f32.xlu0 %v1358_v28 }
 0x1eb   : > { %v1319_v31 = vmul.f32 %v2354_v29, %v2354_v29  ;;  %v1367_v34 = vsel %vm1321_vm2, %v1320_v32, 0.0 }
 0x1ec   : > { %1362 = vadd.xlane.f32.xlu1 %v1361_v30 }
 0x1ed   : > { %v1364_v33 = vsel %vm1321_vm2, %v1319_v31, 0.0 }
 0x1ee   : > { %1365 = vadd.xlane.f32.xlu0 %v1364_v33 }
 0x1f0   : > { %1368 = vadd.xlane.f32.xlu1 %v1367_v34 }
 0x259   : > { %v1327_v36 = vpop.xlane.xlu0 %1326 }
 0x25a   : > { %1955 = vrsqrt.f32 %v1327_v36 }
 0x25d   : > { %v1333_v37 = vpop.xlane.xlu1 %1332  ;;  %v1324_v38 = vpop.xlane.xlu0 %1323 }
 0x25e   : > { %1957 = vrsqrt.f32 %v1333_v37 }
 0x25f   : > { %1959 = vrsqrt.f32 %v1324_v38 }
 0x261   : > { %v1330_v40 = vpop.xlane.xlu1 %1329 }
 0x262   : > { %1961 = vrsqrt.f32 %v1330_v40 }
 0x263   : > { %v1336_v41 = vpop.xlane.xlu0 %1335 }
 0x264   : > { %1963 = vrsqrt.f32 %v1336_v41 }
 0x265   : > { %v1339_v42 = vpop.xlane.xlu1 %1338 }
 0x266   : > { %1965 = vrsqrt.f32 %v1339_v42 }
 0x267   : > { %v1956_v43 = vpop.eup %1955  ;;  %v1342_v45 = vpop.xlane.xlu0 %1341 }
 0x268   : > { %v1387_v46 = vmul.f32 %v1956_v43, %v2275_v35  ;;  %1967 = vrsqrt.f32 %v1342_v45 }
 0x269   : > { %v1345_v47 = vpop.xlane.xlu1 %1344 }
 0x26a   : > { %1403 = vst.msk [vmem:[%s2367_s23 + $0x8] sm:$0xff] %vm1321_vm2, %v1387_v46  ;;  %1969 = vrsqrt.f32 %v1345_v47 }
 0x26b   : > { %v1958_v53 = vpop.eup %1957  ;;  %v1348_v48 = vpop.xlane.xlu0 %1347 }
 0x26c   : > { %v1960_v56 = vpop.eup %1959  ;;  %v1389_v58 = vmul.f32 %v1958_v53, %v2286_v44  ;;  %1971 = vrsqrt.f32 %v1348_v48 }
 0x26d   : > { %v1386_v59 = vmul.f32 %v1960_v56, %v2280_v39  ;;  %v1351_v49 = vpop.xlane.xlu1 %1350 }
 0x26e   : > { %1405 = vst.msk [vmem:[%s2367_s23 + $0x18] sm:$0xff] %vm1321_vm2, %v1389_v58  ;;  %1973 = vrsqrt.f32 %v1351_v49 }
 0x26f   : > { %v1962_v35 = vpop.eup %1961  ;;  %1402 = vst.msk [vmem:[%s2367_s23] sm:$0xff] %vm1321_vm2, %v1386_v59  ;;  %v1354_v61 = vpop.xlane.xlu0 %1353 }
 0x270   : > { %v1388_v0 = vmul.f32 %v1962_v35, %v2291_v50  ;;  %1975 = vrsqrt.f32 %v1354_v61 }
 0x271   : > { %v1964_v1 = vpop.eup %1963  ;;  %v1357_v2 = vpop.xlane.xlu1 %1356 }
 0x272   : > { %1404 = vst.msk [vmem:[%s2367_s23 + $0x10] sm:$0xff] %vm1321_vm2, %v1388_v0  ;;  %v1390_v39 = vmul.f32 %v1964_v1, %v2301_v63  ;;  %1977 = vrsqrt.f32 %v1357_v2 }
 0x273   : > { %v1966_v44 = vpop.eup %1965  ;;  %v1360_v51 = vpop.xlane.xlu0 %1359 }
 0x274   : > { %1406 = vst.msk [vmem:[%s2367_s23 + $0x20] sm:$0xff] %vm1321_vm2, %v1390_v39  ;;  %v1391_v3 = vmul.f32 %v1966_v44, %v2298_v60  ;;  %1979 = vrsqrt.f32 %v1360_v51 }
 0x275   : > { %v1968_v5 = vpop.eup %1967  ;;  %v1363_v50 = vpop.xlane.xlu1 %1362 }
 0x276   : > { %1407 = vst.msk [vmem:[%s2367_s23 + $0x28] sm:$0xff] %vm1321_vm2, %v1391_v3  ;;  %v1392_v6 = vmul.f32 %v1968_v5, %v2313_v7  ;;  %1981 = vrsqrt.f32 %v1363_v50 }
 0x277   : > { %v1970_v52 = vpop.eup %1969  ;;  %v1366_v63 = vpop.xlane.xlu0 %1365 }
 0x278   : > { %1408 = vst.msk [vmem:[%s2367_s23 + $0x30] sm:$0xff] %vm1321_vm2, %v1392_v6  ;;  %v1393_v8 = vmul.f32 %v1970_v52, %v2309_v4  ;;  %1983 = vrsqrt.f32 %v1366_v63 }
 0x279   : > { %v1972_v60 = vpop.eup %1971  ;;  %v1369_v9 = vpop.xlane.xlu1 %1368 }
 0x27a   : > { %1409 = vst.msk [vmem:[%s2367_s23 + $0x38] sm:$0xff] %vm1321_vm2, %v1393_v8  ;;  %v1394_v10 = vmul.f32 %v1972_v60, %v2324_v14  ;;  %1985 = vrsqrt.f32 %v1369_v9 }
 0x27b   : > { %v1974_v7 = vpop.eup %1973 }
 0x27c   : > { %1410 = vst.msk [vmem:[%s2367_s23 + $0x40] sm:$0xff] %vm1321_vm2, %v1394_v10  ;;  %v1395_v11 = vmul.f32 %v1974_v7, %v2321_v12 }
 0x27d   : > { %v1976_v54 = vpop.eup %1975 }
 0x27e   : > { %1411 = vst.msk [vmem:[%s2367_s23 + $0x48] sm:$0xff] %vm1321_vm2, %v1395_v11  ;;  %v1396_v4 = vmul.f32 %v1976_v54, %v2334_v18 }
 0x27f   : > { %v1978_v13 = vpop.eup %1977 }
 0x280   : > { %1412 = vst.msk [vmem:[%s2367_s23 + $0x50] sm:$0xff] %vm1321_vm2, %v1396_v4  ;;  %v1397_v15 = vmul.f32 %v1978_v13, %v2331_v17 }
 0x281   : > { %v1980_v14 = vpop.eup %1979 }
 0x282   : > { %1413 = vst.msk [vmem:[%s2367_s23 + $0x58] sm:$0xff] %vm1321_vm2, %v1397_v15  ;;  %v1398_v16 = vmul.f32 %v1980_v14, %v2344_v23 }
 0x283   : > { %v1982_v55 = vpop.eup %1981 }
 0x284   : > { %1414 = vst.msk [vmem:[%s2367_s23 + $0x60] sm:$0xff] %vm1321_vm2, %v1398_v16  ;;  %v1399_v12 = vmul.f32 %v1982_v55, %v2341_v22 }
 0x285   : > { %v1984_v57 = vpop.eup %1983 }
 0x286   : > { %1415 = vst.msk [vmem:[%s2367_s23 + $0x68] sm:$0xff] %vm1321_vm2, %v1399_v12  ;;  %v1400_v18 = vmul.f32 %v1984_v57, %v2354_v29 }
 0x287   : > { %v1986_v19 = vpop.eup %1985 }
 0x288   : > { %1416 = vst.msk [vmem:[%s2367_s23 + $0x70] sm:$0xff] %vm1321_vm2, %v1400_v18  ;;  %v1401_v17 = vmul.f32 %v1986_v19, %v2351_v27 }
 0x28a   : > { %1417 = vst.msk [vmem:[%s2367_s23 + $0x78] sm:$0xff] %vm1321_vm2, %v1401_v17 }
 0x28b PF: > { %s19_s30 = sadd.s32 1, %s1993_s30  }
 0x28c   : > { %p16_p4 = scmp.ge.s32.totalorder %s19_s30, 4  }
 0x28e   :  { %18 = sbr.rel (!%p16_p4) target bundleno = 1 (0x1), region = 92 }

</bundles_post_ra>
